<compile_context>
chip_gen: v7x
topology: tpu7x:2x2x1
jax: 0.10.0
libtpu: 0.0.40
codegen_flags: <defaults>
</compile_context>

<pallas_src>
import math
import functools

import jax
import jax.numpy as jnp
from jax import lax
from jax.experimental import pallas as pl
from jax.experimental.pallas import tpu as pltpu


def _rel_pe_kernel(freq_ref, phase_ref, o_ref, tbl_ref, *, seq_len: int, tile_l: int):
    # freq_ref/phase_ref: (1, d_model) resident VMEM rows.
    # o_ref:   (tile_l, d_model) output block (batch dim squeezed).
    # tbl_ref: (tile_l, d_model) VMEM scratch, persists across the batch axis.
    i = pl.program_id(0)   # row-tile index
    b = pl.program_id(1)   # batch index (innermost grid axis)

    @pl.when(b == 0)
    def _():
        row = lax.broadcasted_iota(jnp.int32, (tile_l, 1), 0) + i * tile_l
        rel = ((seq_len - 1) - row).astype(jnp.float32)              # (tile_l, 1)
        # One sin per element (EUP); the FMA is VPU broadcast math.
        tbl_ref[...] = jnp.sin(rel * freq_ref[...] + phase_ref[...])

    o_ref[...] = tbl_ref[...].astype(o_ref.dtype)


def relative_positional_encoding(x: jax.Array, d_model: int) -> jax.Array:
    """Pallas implementation of RelativePositionalEncoding.forward.

    x: (B, T, ...) -- only B and T are used.
    returns: (B, 2*T - 1, d_model) float32
    """
    assert d_model % 2 == 0, "d_model must be even (matches the PyTorch module)"
    B = x.shape[0]
    T = x.shape[1]
    L = 2 * T - 1

    # Hoisted per-column frequency and phase (computed once, outside the kernel):
    #   freq[j]  = exp(-(2*(j//2)) * ln(10000)/d_model)
    #   phase[j] = (j % 2) * pi/2     (cos(x) == sin(x + pi/2) for odd columns)
    col = jnp.arange(d_model, dtype=jnp.int32)
    freq = jnp.exp(
        ((col // 2) * 2).astype(jnp.float32) * (-math.log(10000.0) / d_model)
    )[None, :]                                                   # (1, d_model)
    phase = ((col % 2).astype(jnp.float32) * (math.pi / 2.0))[None, :]

    # Row tiling: byte-capped so (2x output buffer + scratch) stays small on
    # every generation; single row tile whenever the whole table fits.
    bytes_per_row = d_model * 4
    rows_budget = (4 * 1024 * 1024) // bytes_per_row             # <= 4 MiB / buffer
    rows_budget = max(8, (rows_budget // 8) * 8)                 # multiple of 8
    tile_l = L if L <= rows_budget else rows_budget
    n_row_tiles = pl.cdiv(L, tile_l)

    kernel = functools.partial(_rel_pe_kernel, seq_len=T, tile_l=tile_l)

    pe = pl.pallas_call(
        kernel,
        out_shape=jax.ShapeDtypeStruct((B, L, d_model), jnp.float32),
        grid_spec=pltpu.PrefetchScalarGridSpec(
            num_scalar_prefetch=0,
            grid=(n_row_tiles, B),
            in_specs=[
                pl.BlockSpec((1, d_model), lambda i, b: (0, 0)),   # freq (resident)
                pl.BlockSpec((1, d_model), lambda i, b: (0, 0)),   # phase (resident)
            ],
            out_specs=pl.BlockSpec((None, tile_l, d_model), lambda i, b: (b, i, 0)),
            scratch_shapes=[pltpu.VMEM((tile_l, d_model), jnp.float32)],
        ),
        compiler_params=pltpu.CompilerParams(
            dimension_semantics=("parallel", "arbitrary"),
        ),
        cost_estimate=pl.CostEstimate(
            flops=2 * L * d_model,
            transcendentals=L * d_model,
            bytes_accessed=B * L * d_model * 4 + 2 * d_model * 4,
        ),
    )(freq, phase)
    return pe


def _reference(x: jax.Array, d_model: int) -> jax.Array:
    """Pure-JAX port of the PyTorch forward, for verification."""
    B, T = x.shape[0], x.shape[1]
    div_term = jnp.exp(
        jnp.arange(0, d_model, 2, dtype=jnp.float32) * -(math.log(10000.0) / d_model)
    )[None, :]                                               # (1, d_model//2)
    position = jnp.arange(0, T, dtype=jnp.float32)[:, None]  # (T, 1)
    angles = position @ div_term                             # (T, d_model//2)

    pe_positive = jnp.zeros((T, d_model), jnp.float32)
    pe_negative = jnp.zeros((T, d_model), jnp.float32)
    pe_positive = pe_positive.at[:, 0::2].set(jnp.sin(angles))
    pe_positive = pe_positive.at[:, 1::2].set(jnp.cos(angles))
    pe_negative = pe_negative.at[:, 0::2].set(jnp.sin(-angles))
    pe_negative = pe_negative.at[:, 1::2].set(jnp.cos(-angles))

    pe_positive = jnp.flip(pe_positive, axis=0)[None]        # (1, T, d_model)
    pe_negative = pe_negative[1:][None]                      # (1, T-1, d_model)
    pe = jnp.concatenate([pe_positive, pe_negative], axis=1) # (1, 2T-1, d_model)
    return jnp.tile(pe, (B, 1, 1))


if __name__ == "__main__":
    key = jax.random.PRNGKey(0)
    B, T, d_model = 2, 8, 32
    x = jax.random.normal(key, (B, T, d_model), dtype=jnp.float32)

    pe = relative_positional_encoding(x, d_model)
    pe = jax.block_until_ready(pe)

    ref = _reference(x, d_model)
    assert pe.shape == (B, 2 * T - 1, d_model)
    assert pe.dtype == jnp.float32
    assert jnp.allclose(pe, ref, atol=1e-5, rtol=1e-5)

    print("KERNEL_OK")
</pallas_src>

<mosaic_0001>
module attributes {stable_mosaic.version = 11 : i64} {
  func.func @_rel_pe_kernel(%arg0: i32, %arg1: i32, %arg2: memref<1x32xf32, #tpu.memory_space<vmem>>, %arg3: memref<1x32xf32, #tpu.memory_space<vmem>>, %arg4: memref<1x15x32xf32, #tpu.memory_space<vmem>>, %arg5: memref<15x32xf32, #tpu.memory_space<vmem>>) attributes {dimension_semantics = [#tpu.dimension_semantics<parallel>, #tpu.dimension_semantics<arbitrary>], iteration_bounds = array<i64: 1, 2>, scalar_prefetch = 0 : i64, scratch_operands = 1 : i64, tpu.core_type = #tpu.core_type<tc>, window_params = [{pipeline_mode = #tpu.pipeline_mode<synchronous>, transform_indices = @transform_0, window_bounds = array<i64: 1, 32>}, {pipeline_mode = #tpu.pipeline_mode<synchronous>, transform_indices = @transform_1, window_bounds = array<i64: 1, 32>}, {transform_indices = @transform_2, window_bounds = array<i64: 1, 15, 32>}]} {
    %c0_i32 = arith.constant 0 : i32
    %0 = arith.cmpi eq, %arg1, %c0_i32 : i32
    %1 = arith.extui %0 : i1 to i32
    %c0_i32_0 = arith.constant 0 : i32
    %2 = arith.cmpi ne, %1, %c0_i32_0 : i32
    scf.if %2 {
      %7 = tpu.iota {dimensions = array<i32: 0>} : vector<15x1xi32>
      %c15_i32 = arith.constant 15 : i32
      %8 = arith.muli %arg0, %c15_i32 : i32
      %9 = vector.broadcast %8 : i32 to vector<15x1xi32>
      %10 = arith.addi %7, %9 : vector<15x1xi32>
      %c7_i32 = arith.constant 7 : i32
      %11 = vector.broadcast %c7_i32 : i32 to vector<15x1xi32>
      %12 = arith.subi %11, %10 : vector<15x1xi32>
      %13 = arith.sitofp %12 : vector<15x1xi32> to vector<15x1xf32>
      %c0_5 = arith.constant 0 : index
      %c0_6 = arith.constant 0 : index
      %14 = vector.load %arg2[%c0_5, %c0_6] : memref<1x32xf32, #tpu.memory_space<vmem>>, vector<1x32xf32>
      %15 = vector.broadcast %13 : vector<15x1xf32> to vector<15x32xf32>
      %16 = vector.broadcast %14 : vector<1x32xf32> to vector<15x32xf32>
      %17 = arith.mulf %15, %16 : vector<15x32xf32>
      %c0_7 = arith.constant 0 : index
      %c0_8 = arith.constant 0 : index
      %18 = vector.load %arg3[%c0_7, %c0_8] : memref<1x32xf32, #tpu.memory_space<vmem>>, vector<1x32xf32>
      %19 = vector.broadcast %18 : vector<1x32xf32> to vector<15x32xf32>
      %20 = arith.addf %17, %19 : vector<15x32xf32>
      %21 = math.sin %20 : vector<15x32xf32>
      %c0_9 = arith.constant 0 : index
      %c0_10 = arith.constant 0 : index
      %22 = vector.load %arg5[%c0_9, %c0_10] : memref<15x32xf32, #tpu.memory_space<vmem>>, vector<15x32xf32>
      tpu.vector_store %arg5[%c0_9, %c0_10], %21 {strides = array<i32>} : memref<15x32xf32, #tpu.memory_space<vmem>>, vector<15x32xf32>,
    } else {
    }
    %c0 = arith.constant 0 : index
    %c0_1 = arith.constant 0 : index
    %3 = vector.load %arg5[%c0, %c0_1] : memref<15x32xf32, #tpu.memory_space<vmem>>, vector<15x32xf32>
    %c0_2 = arith.constant 0 : index
    %c0_3 = arith.constant 0 : index
    %c0_4 = arith.constant 0 : index
    %4 = vector.load %arg4[%c0_2, %c0_3, %c0_4] : memref<1x15x32xf32, #tpu.memory_space<vmem>>, vector<1x15x32xf32>
    %5 = vector.shape_cast %4 : vector<1x15x32xf32> to vector<15x32xf32>
    %6 = vector.shape_cast %3 : vector<15x32xf32> to vector<1x15x32xf32>
    tpu.vector_store %arg4[%c0_2, %c0_3, %c0_4], %6 {strides = array<i32>} : memref<1x15x32xf32, #tpu.memory_space<vmem>>, vector<1x15x32xf32>,
    return
  }
  func.func @transform_0(%arg0: i32, %arg1: i32) -> (i32, i32) {
    %c0_i32 = arith.constant 0 : i32
    %c0_i32_0 = arith.constant 0 : i32
    %c0_i32_1 = arith.constant 0 : i32
    return %c0_i32, %c0_i32_0 : i32, i32
  }
  func.func @transform_1(%arg0: i32, %arg1: i32) -> (i32, i32) {
    %c0_i32 = arith.constant 0 : i32
    %c0_i32_0 = arith.constant 0 : i32
    %c0_i32_1 = arith.constant 0 : i32
    return %c0_i32, %c0_i32_0 : i32, i32
  }
  func.func @transform_2(%arg0: i32, %arg1: i32) -> (i32, i32, i32) {
    %c0_i32 = arith.constant 0 : i32
    %c0_i32_0 = arith.constant 0 : i32
    return %arg1, %arg0, %c0_i32 : i32, i32, i32
  }
}

</mosaic_0001>

<bundles_post_ra>
// kernel: tpu_custom_call.1
= control target key start
LH: loop header
LB: loop body
LE: loop exit
PB: predicated region body
PF: predicated region fallthrough
CT: control target
= control target key end

     0   :  { %7 = vsyncpa [#allocation4], 0  ;;  %s649_s9 = smov 0   ;;  %s651_s10 = smov 0   ;;  %s806_s0 = inlined_call_operand.hbm [shape: f32[1,32], index: 0, kind: input, shape index: {}]   ;;  %s807_s1 = inlined_call_operand.vmem [shape: f32[1,32], index: 1, kind: input, shape index: {}]   ;;  %s808_s2 = inlined_call_operand.vmem [shape: f32[2,15,32], index: 2, kind: output, shape index: {}]  }
   0x1   :  { %s653_s11 = smov 0  }
   0x2 LB: > { %s492_s12 = sadd.s32 4294967295, %s625_s11   ;;  %s22_s13 = sadd.s32 1, %s621_s10  ;;  %s625_s11 = sphi %s653_s11, %s13_s11   ;;  %s621_s10 = sphi %s651_s10, %s820_s10   ;;  %s617_s9 = sphi %s649_s9, %s819_s9  }
   0x3   : > { %p23_p0 = scmp.ge.s32.totalorder %s22_s13, 2  ;;  %p494_p1 = scmp.ge.s32.totalorder %s625_s11, 1 }
   0x4   : > { %p100_p2 = scmp.lt.s32.totalorder %s625_s11, 3  ;;  %p674_p4 = scmp.eq.s32.totalorder %s492_s12, 0 }
   0x5   : > { %s822_s13 = smov (%p23_p0, %s22_s13), 0  ;;  %s627_s16 = smov [#allocation3]  }
   0x6   : > { %p670_p3 = pnand %p494_p1, %p100_p2  ;;  %s113_s17 = sshll.u32 %s627_s16, 4  ;;  %s114_s17 = int_to_ptr.vmem [resolvable:$true] %s113_s17 }
   0x7   : > { %s813_s15 = scalar_select %p674_p4, 1, 0 }
   0x8   : > { %s812_s14 = scalar_select %p670_p3, 1, 0 }
   0x9   : > { %p526_p5 = pneg %p670_p3  ;;  %s571_s21 = scalar_lea.hbm %s806_s0, 16 }
   0xa   : > { %p572_p7 = scmp.ne.s32.totalorder %s806_s0, %s571_s21  ;;  %p578_p11 = scmp.lt.u32.totalorder %s571_s21, %s806_s0 }
   0xb   : > { %p682_p6 = pnand %p674_p4, %p526_p5 }
   0xd   : > { %p573_p8 = pneg %p682_p6 }
   0xf   : > { %p574_p9 = pnand %p573_p8, %p572_p7 }
  0x11   : > { %p575_p10 = pneg %p574_p9 }
  0x13   : > { %p580_p12 = pnand %p578_p11, %p575_p10 }
  0x15   : > { %583 = shalt.err (!%p580_p12)
}
  0x16   : > { %s584_s26 = scalar_lea.vmem %s114_s17, 16  ;;  %s591_s27 = scalar_lea.vmem %s114_s17, 32 }
  0x17   : > { %p585_p13 = scmp.ne.s32.totalorder %s114_s17, %s584_s26  ;;  %p592_p2 = scmp.lt.s32.totalorder %s114_s17, %s114_s17 }
  0x18   : > { %p593_p5 = scmp.lt.s32.totalorder %s591_s27, %s584_s26 }
  0x19   : > { %p587_p0 = pnand %p585_p13, %p573_p8 }
  0x1a   : > { %p594_p4 = por %p593_p5, %p592_p2 }
  0x1b   : > { %p588_p1 = pneg %p587_p0 }
  0x1d   : > { %p595_p3 = pnand %p594_p4, %p588_p1 }
  0x1f   : > { %598 = shalt.err (!%p595_p3)
}
  0x20   : > { %529 = dma.hbm_to_vmem [thread:$0]  (!%p682_p6), %s806_s0, 16, %s114_s17, [#allocation4]  }
  0x21   : > { %p815_p7 = scmp.ne.s32.totalorder %s812_s14, 0 }
  0x22   : > { %p816_p9 = scmp.ne.s32.totalorder (!%p815_p7), %s813_s15, 0 }
  0x23   : > { %129 = sbr.rel (%p815_p7) target bundleno = 155 (0x9b), region = 28 }
  0x2a   : > { %612 = dma.done.wait (%p816_p9), [#allocation4], 16  }
  0x2b   : > { %614 = vsyncadd (%p816_p9), [#allocation4], 4294967280  ;;  %p151_p8 = scmp.lt.s32.totalorder %s617_s9, 1  ;;  %p500_p3 = scmp.ne.s32.totalorder %s617_s9, 0 }
  0x2c   : > { %v164_v0 = vlaneseq (!%p500_p3)  ;;  %v501_v4 = vld [vmem:[#allocation3] ss:$0 sm:$0xff] (!%p500_p3)  ;;  %v502_v7 = vld [vmem:[%s807_s1] ss:$0 sm:$0xff] (!%p500_p3)  ;;  %v628_v32 = vmov (!%p500_p3), 683565275  }
  0x2d   : > { %s152_s30 = scalar_select %p151_p8, %s617_s9, 1 }
  0x2e   : > { %163 = sbr.rel (%p500_p3) target bundleno = 147 (0x93), region = 36  ;;  %v165_v1 = vshrl.u32 (!%p500_p3), %v164_v0, 7  ;;  %v629_v34 = vmov (!%p500_p3), 2475754826   ;;  %v630_v36 = vmov (!%p500_p3), 2131351028  }
  0x2f   : > { %s513_s3 = sshll.u32 %s152_s30, 4  ;;  %v631_v38 = vmov (!%p500_p3), 2102212464   ;;  %v632_v40 = vmov (!%p500_p3), 920167782  }
  0x30   : > { %s713_s6 = scalar_lea.vmem %s808_s2, %s513_s3  ;;  %v166_v2 = vadd.s32 (!%p500_p3), 8, %v165_v1  ;;  %v171_v3 = vsub.s32 (!%p500_p3), 7, %v165_v1  ;;  %v633_v47 = vmov (!%p500_p3), 1326507024  }
  0x32   : > { %v172_v5 = vsub.s32 (!%p500_p3), 7, %v166_v2  ;;  %v173_v6 = vcvt.s32.f32 (!%p500_p3), %v171_v3 }
  0x34   : > { %v174_v8 = vcvt.s32.f32 (!%p500_p3), %v172_v5  ;;  %v182_v9 = vmul.f32 (!%p500_p3), %v501_v4, %v173_v6 }
  0x36   : > { %v183_v10 = vmul.f32 %v501_v4, %v174_v8  ;;  %v719_v11 = vadd.f32 %v502_v7, %v182_v9 }
  0x38   : > { %v721_v12 = vadd.f32 %v502_v7, %v183_v10  ;;  %v193_v13 = vand.u32 2147483647, %v719_v11  ;;  %v196_v14 = vand.u32 2139095040, %v719_v11  ;;  %vm195_vm14 = vcmp.lt.s32.totalorder %v719_v11, 0 }
  0x3a   : > { %v197_v15 = vshrl.u32 %v196_v14, 23  ;;  %v200_v16 = vand.u32 8388607, %v193_v13  ;;  %v297_v17 = vand.u32 2147483647, %v721_v12  ;;  %v300_v18 = vand.u32 2139095040, %v721_v12 }
  0x3b   : > { %vm194_vm15 = vcmp.le.f32.partialorder %v193_v13, 0.7853982 }
  0x3c   : > { %v503_v19 = vadd.s32 4294967169, %v197_v15  ;;  %v301_v20 = vshrl.u32 %v300_v18, 23  ;;  %v201_v22 = vor.u32 8388608, %v200_v16  ;;  %v731_v24 = vand.u32 8388607, %v297_v17 }
  0x3e   : > { %v203_v21 = vadd.s32 1, %v503_v19  ;;  %v507_v23 = vadd.s32 4294967169, %v301_v20  ;;  %v733_v29 = vshll.u32 %v201_v22, 8  ;;  %v305_v30 = vor.u32 8388608, %v731_v24 }
  0x40   : > { %vm204_vm0 = vcmp.gt.s32.totalorder %v203_v21, 0  ;;  %v307_v26 = vadd.s32 1, %v507_v23 }
  0x41   : > { %v205_v25 = vsel %vm204_vm0, %v203_v21, 0  ;;  %vm299_vm0 = vcmp.lt.s32.totalorder %v721_v12, 0 }
  0x42   : > { %v206_v27 = vshrl.u32 %v205_v25, 5  ;;  %v207_v28 = vand.u32 31, %v205_v25  ;;  %vm308_vm1 = vcmp.gt.s32.totalorder %v307_v26, 0 }
  0x43   : > { %v309_v52 = vsel %vm308_vm1, %v307_v26, 0  ;;  %vm784_vm1 = vcmp.le.f32.partialorder %v297_v17, 0.7853982 }
  0x44   : > { %v208_v31 = vsub.s32 32, %v207_v28  ;;  %v210_v33 = vshll.u32 %v628_v32, %v207_v28  ;;  %v213_v35 = vshll.u32 %v629_v34, %v207_v28  ;;  %v216_v37 = vshll.u32 %v630_v36, %v207_v28 }
  0x45   : > { %v219_v39 = vshll.u32 %v631_v38, %v207_v28  ;;  %v222_v41 = vshll.u32 %v632_v40, %v207_v28  ;;  %vm225_vm2 = vcmp.lt.s32.totalorder %v206_v27, 1  ;;  %vm226_vm3 = vcmp.lt.s32.totalorder %v206_v27, 2 }
  0x46   : > { %v209_v42 = vshrl.u32 %v628_v32, %v208_v31  ;;  %v211_v43 = vshrl.u32 %v629_v34, %v208_v31  ;;  %v214_v44 = vshrl.u32 %v630_v36, %v208_v31  ;;  %v217_v45 = vshrl.u32 %v631_v38, %v208_v31 }
  0x47   : > { %v220_v46 = vshrl.u32 %v632_v40, %v208_v31  ;;  %v223_v48 = vshrl.u32 %v633_v47, %v208_v31  ;;  %vm227_vm4 = vcmp.lt.s32.totalorder %v206_v27, 3  ;;  %vm228_vm5 = vcmp.lt.s32.totalorder %v206_v27, 4 }
  0x48   : > { %v212_v49 = vor.u32 %v211_v43, %v210_v33  ;;  %v215_v50 = vor.u32 %v214_v44, %v213_v35  ;;  %v218_v51 = vor.u32 %v217_v45, %v216_v37  ;;  %v310_v55 = vshrl.u32 %v309_v52, 5 }
  0x49   : > { %v221_v53 = vor.u32 %v220_v46, %v219_v39  ;;  %v224_v54 = vor.u32 %v223_v48, %v222_v41  ;;  %v311_v56 = vand.u32 31, %v309_v52 }
  0x4a   : > { %v229_v57 = vsel %vm225_vm2, %v209_v42, %v212_v49  ;;  %v230_v58 = vsel %vm228_vm5, %v218_v51, 2102212464  ;;  %v233_v59 = vsel %vm225_vm2, %v212_v49, %v215_v50  ;;  %v237_v60 = vsel %vm225_vm2, %v215_v50, %v218_v51 }
  0x4b   : > { %v231_v61 = vsel %vm227_vm4, %v215_v50, %v230_v58  ;;  %v234_v62 = vsel %vm228_vm5, %v221_v53, 920167782  ;;  %v238_v63 = vsel %vm228_vm5, %v224_v54, 1326507024  ;;  %v312_v0 = vsub.s32 32, %v311_v56 }
  0x4c   : > { %v232_v1 = vsel %vm226_vm3, %v229_v57, %v231_v61  ;;  %v235_v2 = vsel %vm227_vm4, %v218_v51, %v234_v62  ;;  %v239_v3 = vsel %vm227_vm4, %v221_v53, %v238_v63  ;;  %v314_v4 = vshll.u32 %v628_v32, %v311_v56 }
  0x4d   : > { %v236_v5 = vsel %vm226_vm3, %v233_v59, %v235_v2  ;;  %v240_v6 = vsel %vm226_vm3, %v237_v60, %v239_v3  ;;  %v248_v7 = vmul.u32 %v733_v29, %v232_v1  ;;  %v313_v8 = vshrl.u32 %v628_v32, %v312_v0 }
  0x4e   : > { %v748_v9 = vmul.u32.u64.low %v733_v29, %v240_v6  ;;  %v749_v10 = vmul.u32.u64.high %v733_v29, %v240_v6, %v748_v9  ;;  %v752_v14 = vmul.u32.u64.low %v733_v29, %v236_v5  ;;  %v753_v15 = vmul.u32.u64.high %v733_v29, %v236_v5, %v752_v14 }
  0x4f   : > { %v315_v16 = vshrl.u32 %v629_v34, %v312_v0  ;;  %v317_v18 = vshll.u32 %v629_v34, %v311_v56  ;;  %v318_v19 = vshrl.u32 %v630_v36, %v312_v0  ;;  %v320_v20 = vshll.u32 %v630_v36, %v311_v56 }
  0x50   : > { %v321_v21 = vshrl.u32 %v631_v38, %v312_v0  ;;  %v323_v22 = vshll.u32 %v631_v38, %v311_v56  ;;  %v324_v23 = vshrl.u32 %v632_v40, %v312_v0  ;;  %v326_v25 = vshll.u32 %v632_v40, %v311_v56 }
  0x51   : > { %v316_v26 = vor.u32 %v315_v16, %v314_v4  ;;  %v319_v27 = vor.u32 %v318_v19, %v317_v18  ;;  %v327_v28 = vshrl.u32 %v633_v47, %v312_v0  ;;  %vm329_vm6 = vcmp.lt.s32.totalorder %v310_v55, 1 }
  0x52   : > { %vm250_vm7 = vc.u32 %v749_v10, %v752_v14  ;;  %v251_v31 = vadd.s32 1, %v753_v15  ;;  %v322_v32 = vor.u32 %v321_v21, %v320_v20  ;;  %v345_v29 = vshll.u32 %v305_v30, 8 }
  0x53   : > { %v325_v33 = vor.u32 %v324_v23, %v323_v22  ;;  %v328_v34 = vor.u32 %v327_v28, %v326_v25  ;;  %vm330_vm8 = vcmp.lt.s32.totalorder %v310_v55, 2  ;;  %vm331_vm9 = vcmp.lt.s32.totalorder %v310_v55, 3 }
  0x54   : > { %v252_v35 = vsel %vm250_vm7, %v251_v31, %v753_v15  ;;  %vm332_vm10 = vcmp.lt.s32.totalorder %v310_v55, 4  ;;  %v333_v36 = vsel %vm329_vm6, %v313_v8, %v316_v26  ;;  %v337_v37 = vsel %vm329_vm6, %v316_v26, %v319_v27 }
  0x55   : > { %v253_v38 = vadd.s32 %v252_v35, %v248_v7  ;;  %v334_v39 = vsel %vm332_vm10, %v322_v32, 2102212464  ;;  %v338_v40 = vsel %vm332_vm10, %v325_v33, 920167782  ;;  %v341_v41 = vsel %vm329_vm6, %v319_v27, %v322_v32 }
  0x56   : > { %v335_v42 = vsel %vm331_vm9, %v319_v27, %v334_v39  ;;  %v339_v43 = vsel %vm331_vm9, %v322_v32, %v338_v40  ;;  %v342_v24 = vsel %vm332_vm10, %v328_v34, 1326507024  ;;  %v249_v2 = vadd.s32 %v752_v14, %v749_v10 }
  0x57   : > { %v254_v30 = vadd.s32 536870912, %v253_v38  ;;  %v340_v44 = vsel %vm330_vm8, %v337_v37, %v339_v43  ;;  %v343_v45 = vsel %vm331_vm9, %v325_v33, %v342_v24  ;;  %v336_v46 = vsel %vm330_vm8, %v333_v36, %v335_v42 }
  0x58   : > { %v344_v47 = vsel %vm330_vm8, %v341_v41, %v343_v45  ;;  %v766_v48 = vmul.u32.u64.low %v345_v29, %v340_v44  ;;  %v767_v49 = vmul.u32.u64.high %v345_v29, %v340_v44, %v766_v48  ;;  %v352_v54 = vmul.u32 %v345_v29, %v336_v46 }
  0x59   : > { %v255_v50 = vshrl.u32 %v254_v30, 30  ;;  %v769_v51 = vmul.u32.u64.low %v345_v29, %v344_v47  ;;  %v770_v52 = vmul.u32.u64.high %v345_v29, %v344_v47, %v769_v51  ;;  %vm285_vm5 = vweird.f32 %v719_v11 }
  0x5a   : > { %v355_v56 = vadd.s32 1, %v767_v49  ;;  %vm401_vm6 = vcmask 261120   ;;  %vm389_vm10 = vweird.f32 %v721_v12 }
  0x5b   : > { %v256_v53 = vshll.u32 %v255_v50, 30  ;;  %vm354_vm11 = vc.u32 %v770_v52, %v766_v48  ;;  %v279_v26 = vsub.s32 4, %v255_v50  ;;  %v353_v10 = vadd.s32 %v766_v48, %v770_v52 }
  0x5c   : > { %v356_v58 = vsel %vm354_vm11, %v355_v56, %v767_v49  ;;  %vm403_vm11 = vcmask 260096  }
  0x5d   : > { %v257_v57 = vsub.s32 %v253_v38, %v256_v53  ;;  %v357_v60 = vadd.s32 %v356_v58, %v352_v54  ;;  %v280_v33 = vsel %vm195_vm14, %v279_v26, %v255_v50 }
  0x5e   : > { %v282_v38 = vsel %vm194_vm15, 0, %v280_v33 }
  0x5f   : > { %v259_v59 = vsub.s32 0, %v257_v57  ;;  %v358_v61 = vadd.s32 536870912, %v357_v60  ;;  %v286_v43 = vadd.s32 3, %v282_v38 }
  0x61   : > { %v504_v55 = vmin.u32 %v259_v59, %v257_v57  ;;  %v359_v63 = vshrl.u32 %v358_v61, 30  ;;  %v287_v45 = vand.u32 3, %v286_v43 }
  0x63   : > { %v261_v62 = vclz %v504_v55  ;;  %v360_v1 = vshll.u32 %v359_v63, 30  ;;  %v383_v30 = vsub.s32 4, %v359_v63  ;;  %vm292_vm2 = vcmp.eq.s32.totalorder %v287_v45, 2 }
  0x64   : > { %vm289_vm3 = vcmp.eq.s32.totalorder %v287_v45, 0  ;;  %vm288_vm4 = vcmp.lt.s32.totalorder %v287_v45, 2 }
  0x65   : > { %v505_v0 = vadd.s32 4294967294, %v261_v62  ;;  %v361_v4 = vsub.s32 %v357_v60, %v360_v1  ;;  %v384_v47 = vsel %vm299_vm0, %v383_v30, %v359_v63 }
  0x66   : > { %v386_v51 = vsel %vm784_vm1, 0, %v384_v47 }
  0x67   : > { %vm506_vm12 = vcmp.lt.s32.totalorder %v505_v0, 0  ;;  %v363_v8 = vsub.s32 0, %v361_v4  ;;  %v390_v56 = vadd.s32 3, %v386_v51 }
  0x68   : > { %v264_v3 = vsel %vm506_vm12, 0, %v505_v0 }
  0x69   : > { %v265_v5 = vsub.s32 32, %v264_v3  ;;  %v266_v6 = vshll.u32 %v257_v57, %v264_v3  ;;  %v269_v7 = vsub.s32 4294967266, %v264_v3  ;;  %v508_v16 = vmin.u32 %v363_v8, %v361_v4 }
  0x6a   : > { %v391_v60 = vand.u32 3, %v390_v56 }
  0x6b   : > { %v267_v9 = vshrl.u32 %v249_v2, %v265_v5  ;;  %v270_v15 = vadd.s32 127, %v269_v7  ;;  %v365_v20 = vclz %v508_v16 }
  0x6c   : > { %vm396_vm7 = vcmp.eq.s32.totalorder %v391_v60, 2  ;;  %vm393_vm8 = vcmp.eq.s32.totalorder %v391_v60, 0  ;;  %vm392_vm9 = vcmp.lt.s32.totalorder %v391_v60, 2 }
  0x6d   : > { %v268_v18 = vor.u32 %v267_v9, %v266_v6  ;;  %v271_v19 = vshll.u32 %v270_v15, 23  ;;  %v509_v23 = vadd.s32 4294967294, %v365_v20 }
  0x6f   : > { %v272_v21 = vor.u32 4788187, %v271_v19  ;;  %v275_v22 = vcvt.s32.f32 %v268_v18  ;;  %vm510_vm13 = vcmp.lt.s32.totalorder %v509_v23, 0 }
  0x70   : > { %v368_v27 = vsel %vm510_vm13, 0, %v509_v23 }
  0x71   : > { %v273_v25 = vand.u32 2147483647, %v272_v21  ;;  %v369_v28 = vsub.s32 32, %v368_v27  ;;  %v370_v31 = vshll.u32 %v361_v4, %v368_v27  ;;  %v373_v32 = vsub.s32 4294967266, %v368_v27 }
  0x73   : > { %v276_v14 = vmul.f32 %v275_v22, %v273_v25  ;;  %v371_v34 = vshrl.u32 %v353_v10, %v369_v28  ;;  %v374_v35 = vadd.s32 127, %v373_v32 }
  0x75   : > { %v277_v29 = vxor.u32 2147483648, %v276_v14  ;;  %v372_v39 = vor.u32 %v371_v34, %v370_v31  ;;  %v375_v40 = vshll.u32 %v374_v35, 23 }
  0x77   : > { %v278_v36 = vsel %vm195_vm14, %v277_v29, %v276_v14  ;;  %v376_v41 = vor.u32 4788187, %v375_v40  ;;  %v379_v42 = vcvt.s32.f32 %v372_v39 }
  0x78   : > { %v281_v37 = vsel %vm194_vm15, %v719_v11, %v278_v36 }
  0x79   : > { %563 = vcosq.f32 %v281_v37  ;;  %v377_v24 = vand.u32 2147483647, %v376_v41 }
  0x7a   : > { %565 = vsinq.f32 %v281_v37 }
  0x7b   : > { %v380_v44 = vmul.f32 %v379_v42, %v377_v24 }
  0x7d   : > { %v381_v46 = vxor.u32 2147483648, %v380_v44 }
  0x7f   : > { %v382_v48 = vsel %vm299_vm0, %v381_v46, %v380_v44 }
  0x80   : > { %v385_v50 = vsel %vm784_vm1, %v721_v12, %v382_v48 }
  0x81   : > { %567 = vcosq.f32 %v385_v50 }
  0x82   : > { %569 = vsinq.f32 %v385_v50 }
  0x83   : > { %v564_v49 = vpop.eup %563 }
  0x84   : > { %v566_v52 = vpop.eup %565  ;;  %v293_v53 = vxor.u32 2147483648, %v564_v49 }
  0x85   : > { %v290_v17 = vxor.u32 2147483648, %v566_v52 }
  0x86   : > { %v294_v54 = vsel %vm292_vm2, %v293_v53, %v566_v52 }
  0x87   : > { %v291_v57 = vsel %vm289_vm3, %v564_v49, %v290_v17 }
  0x88   : > { %v295_v58 = vsel %vm288_vm4, %v291_v57, %v294_v54 }
  0x89   : > { %v296_v59 = vsel %vm285_vm5, nan, %v295_v58 }
  0x8a   : > { %402 = vst.msk [vmem:[#allocation2] sm:$0xff] %vm401_vm6, %v296_v59 }
  0x8b   : > { %v568_v55 = vpop.eup %567 }
  0x8c   : > { %v570_v61 = vpop.eup %569  ;;  %v397_v62 = vxor.u32 2147483648, %v568_v55 }
  0x8d   : > { %v394_v63 = vxor.u32 2147483648, %v570_v61 }
  0x8e   : > { %v398_v0 = vsel %vm396_vm7, %v397_v62, %v570_v61 }
  0x8f   : > { %v395_v1 = vsel %vm393_vm8, %v568_v55, %v394_v63 }
  0x90   : > { %v399_v11 = vsel %vm392_vm9, %v395_v1, %v398_v0 }
  0x91   : > { %v400_v2 = vsel %vm389_vm10, nan, %v399_v11 }
  0x92   : > { %404 = vst.msk [vmem:[#allocation2 + $0x8] sm:$0x7f] %vm403_vm11, %v400_v2 }
  0x93 PF: > { %v405_v3 = vld [vmem:[#allocation2] sm:$0xff]  ;;  %vm407_vm12 = vcmask 261120   ;;  %vm409_vm13 = vcmask 260096  }
  0x94   : > { %408 = vst.msk [vmem:[%s713_s6] sm:$0xff] %vm407_vm12, %v405_v3 }
  0x99   : > { %v406_v4 = vld [vmem:[#allocation2 + $0x8] sm:$0x7f] }
  0x9a   : > { %410 = vst.msk [vmem:[%s713_s6 + $0x8] sm:$0x7f] %vm409_vm13, %v406_v4 }
  0x9b PF: > { %s13_s11 = sadd.s32 1, %s625_s11   ;;  %s819_s9 = smov %s621_s10 }
  0x9c   : > { %p10_p4 = scmp.ge.s32.totalorder %s13_s11, 4   ;;  %s820_s10 = smov %s822_s13 }
  0x9e   :  { %12 = sbr.rel (!%p10_p4) target bundleno = 2 (0x2), region = 64 }
  0xa5   :  { %441 = vsyncpa [#allocation4], 1 }
  0xa6   :  { %443 = vsyncpa [#allocation4 + $0x1], 1 }

</bundles_post_ra>
